<compile_context>
chip_gen: v7x
topology: tpu7x:2x2x1
jax: 0.10.0
libtpu: 0.0.40
codegen_flags: <defaults>
</compile_context>

<pallas_src>
import jax
import jax.numpy as jnp
from jax import lax
from jax.experimental import pallas as pl
from jax.experimental.pallas import tpu as pltpu


# ----------------------------------------------------------------------------- helpers
def _round_up(x, m):
    return (x + m - 1) // m * m


def _min_sublane(dtype):
    # Minimum second-to-last-dim tile for a packed dtype: 8 (f32), 16 (bf16), 32 (int8/fp8).
    bits = jnp.dtype(dtype).itemsize * 8
    return max(8, 256 // bits)


def _largest_tile(extent, target, lane=128):
    """Largest multiple of `lane` that divides `extent` (a multiple of lane) and is <= target."""
    nb = extent // lane
    t = max(1, min(max(target, lane) // lane, nb))
    while nb % t:
        t -= 1
    return t * lane


def _pad_and_tile_for_reduction(size, target, lane=128, max_waste_frac=0.05):
    """Pick (padded_extent, tile) for the streamed contraction axis.

    Pads minimally past lane alignment (bounded extra columns, <= max_waste_frac
    of `size`) so that a tile as close to `target` as possible divides the
    padded extent evenly — avoids both per-call padding and tile-multiple
    over-streaming of dead weight columns.
    """
    base = _round_up(size, lane)
    extra_budget = (int(size * max_waste_frac) // lane) * lane
    best_pad, best_tile = base, _largest_tile(base, target, lane)
    p = base + lane
    while p <= base + extra_budget and best_tile < max(target, lane):
        t = _largest_tile(p, target, lane)
        if t > best_tile:
            best_pad, best_tile = p, t
        p += lane
    return best_pad, best_tile


# ----------------------------------------------------------------------------- kernel
def _linear_kernel(x_ref, w_ref, b_ref, o_ref, acc_ref):
    # x_ref : [Bp, Vp]  (VMEM-resident activation slab, constant across grid)
    # w_ref : [tn, tk]  (torch layout [D, V] block, streamed; possibly bf16)
    # b_ref : [1, tn]   (f32)
    # o_ref : [Bp, tn]  (output tile)
    # acc_ref: [Bp, tn] f32 scratch accumulator
    k = pl.program_id(1)
    tk = w_ref.shape[1]

    @pl.when(k == 0)
    def _():
        acc_ref[...] = jnp.zeros_like(acc_ref)

    off = pl.multiple_of(k * tk, 128)        # lane-aligned dynamic slice of resident x
    x_blk = x_ref[:, pl.ds(off, tk)]
    w_blk = w_ref[...]
    if x_blk.dtype != w_blk.dtype:           # bf16 weight streaming: cast tiny x tile
        x_blk = x_blk.astype(w_blk.dtype)

    # x @ w.T without materializing a transpose: contract dim 1 of both operands.
    acc_ref[...] += lax.dot_general(
        x_blk, w_blk,
        dimension_numbers=(((1,), (1,)), ((), ())),
        preferred_element_type=jnp.float32)

    @pl.when(k == pl.num_programs(1) - 1)
    def _():
        o_ref[...] = (acc_ref[...] + b_ref[...]).astype(o_ref.dtype)


# ----------------------------------------------------------------------------- init (one-time)
def prepare_mlp_encoder_params(weight, bias, *, stream_dtype=jnp.bfloat16,
                               tn_target=256, tk_target=8192):
    """One-time parameter preparation (do this at init, OUTSIDE the hot path).

    weight: [D, V] torch nn.Linear layout, bias: [D].
    Returns (w_padded, b_padded, meta) for mlp_encoder_forward.
    """
    D, V = weight.shape
    Dp = _round_up(D, 128)
    # >= 2 tiles along the parallel d_model axis whenever possible, so both
    # v7x TensorCores (and both HBM paths) are used; tiles stay lane-dense.
    tn = _largest_tile(Dp, min(tn_target, max(128, Dp // 2)))
    Vp, tk = _pad_and_tile_for_reduction(V, tk_target)

    w = weight
    if (Dp, Vp) != (D, V):
        w = jnp.pad(w, ((0, Dp - D), (0, Vp - V)))
    w = w.astype(stream_dtype)               # bf16 halves HBM bytes; f32 for exact parity

    b = bias if Dp == D else jnp.pad(bias, (0, Dp - D))
    b = b.reshape(1, Dp).astype(jnp.float32)
    return w, b, {"D": D, "V": V, "tn": tn, "tk": tk}


# ----------------------------------------------------------------------------- forward
def mlp_encoder_forward(src_seq, w_prepared, b_prepared, meta):
    """src_seq: [B, V]. Returns (enc_output.view(B, 1, -1), None) like MLPEncoder.forward."""
    B, V = src_seq.shape
    D, tn, tk = meta["D"], meta["tn"], meta["tk"]
    Dp, Vp = w_prepared.shape
    out_dtype = src_seq.dtype

    sub = _min_sublane(src_seq.dtype)
    Bp = _round_up(max(B, sub), sub)
    x = src_seq
    if (Bp, Vp) != (B, V):                   # cheap: activations are only Bp rows
        x = jnp.pad(x, ((0, Bp - B), (0, Vp - V)))

    grid = (Dp // tn, Vp // tk)              # (d_model tiles, vocab tiles) — reduction last

    isz = lambda dt: jnp.dtype(dt).itemsize
    cost = pl.CostEstimate(
        flops=2 * Bp * Vp * Dp,
        transcendentals=0,
        bytes_accessed=(isz(x.dtype) * Bp * Vp
                        + isz(w_prepared.dtype) * Vp * Dp
                        + isz(out_dtype) * Bp * Dp
                        + 4 * Dp))

    # Scoped-VMEM request: double-buffered weight + resident x slab + out + acc + margin.
    vmem_need = (2 * tn * tk * isz(w_prepared.dtype)
                 + 2 * Bp * Vp * isz(x.dtype)
                 + 2 * Bp * tn * isz(out_dtype)
                 + Bp * tn * 4 + 2 * tn * 4)
    vmem_limit = int(min(max(vmem_need + (8 << 20), 32 << 20), 48 << 20))

    out = pl.pallas_call(
        _linear_kernel,
        out_shape=jax.ShapeDtypeStruct((Bp, Dp), out_dtype),
        grid_spec=pltpu.PrefetchScalarGridSpec(
            num_scalar_prefetch=0,
            grid=grid,
            in_specs=[
                # Activation slab: full width, constant index map -> stays VMEM-resident.
                pl.BlockSpec((Bp, Vp), lambda n, k: (0, 0)),
                # Weight in torch layout [D, V]; the only streamed operand.
                pl.BlockSpec((tn, tk), lambda n, k: (n, k)),
                # Bias.
                pl.BlockSpec((1, tn), lambda n, k: (0, n)),
            ],
            out_specs=pl.BlockSpec((Bp, tn), lambda n, k: (0, n)),
            scratch_shapes=[pltpu.VMEM((Bp, tn), jnp.float32)],
        ),
        compiler_params=pltpu.CompilerParams(
            dimension_semantics=("parallel", "arbitrary"),
            vmem_limit_bytes=vmem_limit),
        cost_estimate=cost,
    )(x, w_prepared, b_prepared)

    # Drop padding, then apply the torch .view(src_seq.size(0), 1, -1).
    enc_output = out[:B, :D].reshape(B, 1, -1)
    return enc_output, None                  # return_attns path always yields None


# ----------------------------------------------------------------------------- demo / self-check
if __name__ == "__main__":
    # Small shapes consistent with the module's forward:
    #   src_seq: [batch, n_src_vocab]; Linear(n_src_vocab -> d_model).
    batch, n_src_vocab, d_model = 2, 32, 64

    key = jax.random.PRNGKey(0)
    k_x, k_w, k_b = jax.random.split(key, 3)

    src_seq = jax.random.normal(k_x, (batch, n_src_vocab), dtype=jnp.float32)
    bound = 1.0 / (n_src_vocab ** 0.5)
    weight = jax.random.uniform(k_w, (d_model, n_src_vocab),
                                minval=-bound, maxval=bound, dtype=jnp.float32)
    bias = jax.random.uniform(k_b, (d_model,),
                              minval=-bound, maxval=bound, dtype=jnp.float32)

    # src_pos / adj are unused by the forward pass; placeholders for parity.
    adj = None
    src_pos = jnp.zeros((batch, 1), dtype=jnp.int32)

    ref = (src_seq @ weight.T + bias).reshape(batch, 1, -1)

    # --- Exact-parity path: stream the weight in f32 (tight tolerance). ---
    w32, b32, meta32 = prepare_mlp_encoder_params(weight, bias, stream_dtype=jnp.float32)
    enc32, attns = mlp_encoder_forward(src_seq, w32, b32, meta32)
    enc32 = jax.block_until_ready(enc32)
    assert enc32.shape == (batch, 1, d_model)
    assert attns is None
    assert jnp.allclose(enc32, ref, atol=1e-4, rtol=1e-4)

    # --- Production path: weight streamed as bf16 (half HBM bytes, f32 accumulate). ---
    wbf, bbf, metabf = prepare_mlp_encoder_params(weight, bias)   # default bf16
    encbf, _ = mlp_encoder_forward(src_seq, wbf, bbf, metabf)
    encbf = jax.block_until_ready(encbf)
    assert encbf.shape == (batch, 1, d_model)
    assert jnp.allclose(encbf, ref, atol=3e-2, rtol=3e-2)

    print("KERNEL_OK")
</pallas_src>

<mosaic_0001>
module attributes {stable_mosaic.version = 11 : i64} {
  func.func @_linear_kernel(%arg0: i32, %arg1: i32, %arg2: memref<8x128xf32, #tpu.memory_space<vmem>>, %arg3: memref<128x128xf32, #tpu.memory_space<vmem>>, %arg4: memref<1x128xf32, #tpu.memory_space<vmem>>, %arg5: memref<8x128xf32, #tpu.memory_space<vmem>>, %arg6: memref<8x128xf32, #tpu.memory_space<vmem>>) attributes {dimension_semantics = [#tpu.dimension_semantics<parallel>, #tpu.dimension_semantics<arbitrary>], iteration_bounds = array<i64: 1, 1>, scalar_prefetch = 0 : i64, scratch_operands = 1 : i64, tpu.core_type = #tpu.core_type<tc>, window_params = [{pipeline_mode = #tpu.pipeline_mode<synchronous>, transform_indices = @transform_0, window_bounds = array<i64: 8, 128>}, {transform_indices = @transform_1, window_bounds = array<i64: 128, 128>}, {transform_indices = @transform_2, window_bounds = array<i64: 1, 128>}, {transform_indices = @transform_3, window_bounds = array<i64: 8, 128>}]} {
    %c0_i32 = arith.constant 0 : i32
    %0 = arith.cmpi eq, %arg1, %c0_i32 : i32
    %1 = arith.extui %0 : i1 to i32
    %c0_i32_0 = arith.constant 0 : i32
    %2 = arith.cmpi ne, %1, %c0_i32_0 : i32
    scf.if %2 {
      %cst_9 = arith.constant 0.000000e+00 : f32
      %15 = vector.broadcast %cst_9 : f32 to vector<8x128xf32>
      %c0_10 = arith.constant 0 : index
      %c0_11 = arith.constant 0 : index
      %16 = vector.load %arg6[%c0_10, %c0_11] : memref<8x128xf32, #tpu.memory_space<vmem>>, vector<8x128xf32>
      tpu.vector_store %arg6[%c0_10, %c0_11], %15 {strides = array<i32>} : memref<8x128xf32, #tpu.memory_space<vmem>>, vector<8x128xf32>,
    } else {
    }
    %c128_i32 = arith.constant 128 : i32
    %3 = arith.muli %arg1, %c128_i32 : i32
    %4 = tpu.assume_multiple %3, 128 : i32
    %c0 = arith.constant 0 : index
    %5 = arith.index_cast %4 : i32 to index
    %6 = vector.load %arg2[%c0, %5] : memref<8x128xf32, #tpu.memory_space<vmem>>, vector<8x128xf32>
    %c0_1 = arith.constant 0 : index
    %c0_2 = arith.constant 0 : index
    %7 = vector.load %arg3[%c0_1, %c0_2] : memref<128x128xf32, #tpu.memory_space<vmem>>, vector<128x128xf32>
    %c0_3 = arith.constant 0 : index
    %c0_4 = arith.constant 0 : index
    %8 = vector.load %arg6[%c0_3, %c0_4] : memref<8x128xf32, #tpu.memory_space<vmem>>, vector<8x128xf32>
    %cst = arith.constant dense<0.000000e+00> : vector<8x128xf32>
    %9 = tpu.matmul %6, %7, %cst {dimension_numbers = #tpu.dot_dimension_numbers<[1], [1], [0], [0], [0, 0, 1, 0], [], []>} : vector<8x128xf32>, vector<128x128xf32>, vector<8x128xf32> -> vector<8x128xf32>
    %10 = arith.addf %8, %9 : vector<8x128xf32>
    %c0_5 = arith.constant 0 : index
    %c0_6 = arith.constant 0 : index
    %11 = vector.load %arg6[%c0_5, %c0_6] : memref<8x128xf32, #tpu.memory_space<vmem>>, vector<8x128xf32>
    tpu.vector_store %arg6[%c0_5, %c0_6], %10 {strides = array<i32>} : memref<8x128xf32, #tpu.memory_space<vmem>>, vector<8x128xf32>,
    %c0_i32_7 = arith.constant 0 : i32
    %12 = arith.cmpi eq, %arg1, %c0_i32_7 : i32
    %13 = arith.extui %12 : i1 to i32
    %c0_i32_8 = arith.constant 0 : i32
    %14 = arith.cmpi ne, %13, %c0_i32_8 : i32
    scf.if %14 {
      %c0_9 = arith.constant 0 : index
      %c0_10 = arith.constant 0 : index
      %15 = vector.load %arg6[%c0_9, %c0_10] : memref<8x128xf32, #tpu.memory_space<vmem>>, vector<8x128xf32>
      %c0_11 = arith.constant 0 : index
      %c0_12 = arith.constant 0 : index
      %16 = vector.load %arg4[%c0_11, %c0_12] : memref<1x128xf32, #tpu.memory_space<vmem>>, vector<1x128xf32>
      %17 = vector.broadcast %16 : vector<1x128xf32> to vector<8x128xf32>
      %18 = arith.addf %15, %17 : vector<8x128xf32>
      %c0_13 = arith.constant 0 : index
      %c0_14 = arith.constant 0 : index
      %19 = vector.load %arg5[%c0_13, %c0_14] : memref<8x128xf32, #tpu.memory_space<vmem>>, vector<8x128xf32>
      tpu.vector_store %arg5[%c0_13, %c0_14], %18 {strides = array<i32>} : memref<8x128xf32, #tpu.memory_space<vmem>>, vector<8x128xf32>,
    } else {
    }
    return
  }
  func.func @transform_0(%arg0: i32, %arg1: i32) -> (i32, i32) {
    %c0_i32 = arith.constant 0 : i32
    %c0_i32_0 = arith.constant 0 : i32
    %c0_i32_1 = arith.constant 0 : i32
    return %c0_i32, %c0_i32_0 : i32, i32
  }
  func.func @transform_1(%arg0: i32, %arg1: i32) -> (i32, i32) {
    %c0_i32 = arith.constant 0 : i32
    return %arg0, %arg1 : i32, i32
  }
  func.func @transform_2(%arg0: i32, %arg1: i32) -> (i32, i32) {
    %c0_i32 = arith.constant 0 : i32
    %c0_i32_0 = arith.constant 0 : i32
    return %c0_i32, %arg0 : i32, i32
  }
  func.func @transform_3(%arg0: i32, %arg1: i32) -> (i32, i32) {
    %c0_i32 = arith.constant 0 : i32
    %c0_i32_0 = arith.constant 0 : i32
    return %c0_i32, %arg0 : i32, i32
  }
}

</mosaic_0001>

<bundles_post_ra>
// kernel: tpu_custom_call.1
= control target key start
LH: loop header
LB: loop body
LE: loop exit
PB: predicated region body
PF: predicated region fallthrough
CT: control target
= control target key end

     0   :  { %8 = vsyncpa [#allocation4], 0  ;;  %s401_s0 = inlined_call_operand.hbm [shape: f32[8,128], index: 0, kind: input, shape index: {}]   ;;  %s402_s1 = inlined_call_operand.hbm [shape: f32[128,128], index: 1, kind: input, shape index: {}]   ;;  %s403_s2 = inlined_call_operand.vmem [shape: f32[1,128], index: 2, kind: input, shape index: {}]   ;;  %s404_s3 = inlined_call_operand.hbm [shape: f32[8,128], index: 3, kind: output, shape index: {}]  }
   0x1   :  { %9 = vsyncpa [#allocation7], 0 }
   0x2   :  { %10 = vsyncpa [#allocation5], 0  ;;  %s327_s12 = smov [#allocation3]   ;;  %s328_s14 = smov [#allocation6]  }
   0x3   :  { %s17_s13 = sshll.u32 %s327_s12, 4  ;;  %s26_s15 = sshll.u32 %s328_s14, 4  ;;  %s18_s13 = int_to_ptr.vmem [resolvable:$true] %s17_s13  ;;  %s355_s15 = int_to_ptr.vmem [resolvable:$true] %s26_s15 }
   0x4   :  { %s255_s18 = scalar_lea.hbm %s401_s0, 128 }
   0x5   :  { %p256_p0 = scmp.ne.s32.totalorder %s401_s0, %s255_s18  ;;  %p259_p1 = scmp.lt.u32.totalorder %s255_s18, %s401_s0 }
   0x7   :  { %p261_p2 = pnand %p259_p1, %p256_p0 }
   0x9   :  { %264 = shalt.err (!%p261_p2)
}
   0xa   :  { %s265_s23 = scalar_lea.vmem %s18_s13, 128  ;;  %p270_p4 = scmp.lt.s32.totalorder %s18_s13, %s18_s13 }
   0xb   :  { %p266_p3 = scmp.ne.s32.totalorder %s18_s13, %s265_s23  ;;  %p271_p5 = scmp.lt.s32.totalorder %s265_s23, %s265_s23 }
   0xd   :  { %p272_p6 = por %p271_p5, %p270_p4 }
   0xf   :  { %p273_p7 = pnand %p272_p6, %p266_p3 }
  0x11   :  { %276 = shalt.err (!%p273_p7)
}
  0x12   :  { %20 = dma.hbm_to_vmem [thread:$0]  %s401_s0, 128, %s18_s13, [#allocation4]  }
  0x13   :  { %s277_s28 = scalar_lea.hbm %s402_s1, 2048 }
  0x14   :  { %p278_p8 = scmp.ne.s32.totalorder %s402_s1, %s277_s28  ;;  %p281_p9 = scmp.lt.u32.totalorder %s277_s28, %s402_s1 }
  0x16   :  { %p283_p10 = pnand %p281_p9, %p278_p8 }
  0x18   :  { %286 = shalt.err (!%p283_p10)
}
  0x19   :  { %s287_s6 = scalar_lea.vmem %s355_s15, 2048  ;;  %p292_p12 = scmp.lt.s32.totalorder %s355_s15, %s355_s15 }
  0x1a   :  { %p288_p11 = scmp.ne.s32.totalorder %s355_s15, %s287_s6  ;;  %p293_p13 = scmp.lt.s32.totalorder %s287_s6, %s287_s6 }
  0x1c   :  { %p294_p0 = por %p293_p13, %p292_p12 }
  0x1e   :  { %p295_p1 = pnand %p294_p0, %p288_p11 }
  0x20   :  { %298 = shalt.err (!%p295_p1)
}
  0x21   :  { %s329_s0 = smov 128   ;;  %s330_s7 = smov 8  }
  0x22   :  { %32 = dma.hbm_to_vmem [thread:$0]  %s402_s1, 2048, %s355_s15, [#allocation7], %s329_s0, %s329_s0, %s330_s7  }
  0x23   :  { %321 = dma.done.wait [#allocation4], 128  }
  0x24   :  { %322 = vsyncadd [#allocation4], 4294967168 }
  0x25   :  { %323 = dma.done.wait [#allocation7], 2048  }
  0x26   :  { %324 = vsyncadd [#allocation7], 4294965248  ;;  %v331_v0 = vmov 0.0|0.0   ;;  %vm332_vm0 = vmmov 0   ;;  %v333_v1 = vmov 0.0   ;;  %v51_v2 = vld [vmem:[#allocation6] sm:$0xff] }
  0x27   :  { %223 = vmatprep.subr.bf16.mxu0 %v331_v0  ;;  %220 = vmatprep.mubr.msk.f32.mxu0 %vm332_vm0, %v333_v1  ;;  %v52_v3 = vld [vmem:[#allocation6 + $0x8] sm:$0xff]  ;;  %v53_v5 = vld [vmem:[#allocation6 + $0x10] sm:$0xff]  ;;  %v54_v6 = vld [vmem:[#allocation6 + $0x18] sm:$0xff]  ;;  %s334_s11 = smov [#allocation8]  }
  0x28   :  { %v224_v4 = vpack.c.bf16 %v52_v3, %v51_v2  ;;  %v227_v7 = vpack.c.bf16 %v54_v6, %v53_v5  ;;  %v55_v8 = vld [vmem:[#allocation6 + $0x20] sm:$0xff]  ;;  %v56_v9 = vld [vmem:[#allocation6 + $0x28] sm:$0xff]  ;;  %v57_v11 = vld [vmem:[#allocation6 + $0x30] sm:$0xff]  ;;  %s159_s12 = sshll.u32 %s334_s11, 4  ;;  %s160_s12 = int_to_ptr.vmem [resolvable:$true] %s159_s12 }
  0x29   :  { %v230_v10 = vpack.c.bf16 %v56_v9, %v55_v8  ;;  %v58_v12 = vld [vmem:[#allocation6 + $0x38] sm:$0xff]  ;;  %v59_v14 = vld [vmem:[#allocation6 + $0x40] sm:$0xff]  ;;  %v60_v15 = vld [vmem:[#allocation6 + $0x48] sm:$0xff]  ;;  %s299_s13 = scalar_lea.vmem %s160_s12, 128  ;;  %p304_p3 = scmp.lt.s32.totalorder %s160_s12, %s160_s12 }
  0x2a   :  { %225 = vmatpush3.bf16.xpose.msra.mxu0 %v224_v4  ;;  %v233_v13 = vpack.c.bf16 %v58_v12, %v57_v11  ;;  %v236_v16 = vpack.c.bf16 %v60_v15, %v59_v14  ;;  %v61_v17 = vld [vmem:[#allocation6 + $0x50] sm:$0xff]  ;;  %v62_v18 = vld [vmem:[#allocation6 + $0x58] sm:$0xff]  ;;  %v63_v20 = vld [vmem:[#allocation6 + $0x60] sm:$0xff]  ;;  %p300_p2 = scmp.ne.s32.totalorder %s160_s12, %s299_s13  ;;  %p305_p4 = scmp.lt.s32.totalorder %s299_s13, %s299_s13 }
  0x2b   :  { %226 = vmatprep.subr.bf16.mxu0 %v331_v0  ;;  %v239_v19 = vpack.c.bf16 %v62_v18, %v61_v17  ;;  %v64_v21 = vld [vmem:[#allocation6 + $0x68] sm:$0xff]  ;;  %v65_v23 = vld [vmem:[#allocation6 + $0x70] sm:$0xff]  ;;  %v66_v24 = vld [vmem:[#allocation6 + $0x78] sm:$0xff] }
  0x2c   :  { %v242_v22 = vpack.c.bf16 %v64_v21, %v63_v20  ;;  %v245_v25 = vpack.c.bf16 %v66_v24, %v65_v23  ;;  %v50_v26 = vld [vmem:[#allocation3] sm:$0xff]  ;;  %p306_p5 = por %p305_p4, %p304_p3 }
  0x2d   :  { %v170_v27 = vld [vmem:[%s403_s2] ss:$0 sm:$0xff] }
  0x2e   :  { %p307_p6 = pnand %p306_p5, %p300_p2 }
  0x32   :  { %228 = vmatpush3.bf16.xpose.msra.mxu0 %v227_v7 }
  0x33   :  { %229 = vmatprep.subr.bf16.mxu0 %v331_v0 }
  0x3a   :  { %231 = vmatpush3.bf16.xpose.msra.mxu0 %v230_v10 }
  0x3b   :  { %232 = vmatprep.subr.bf16.mxu0 %v331_v0 }
  0x42   :  { %234 = vmatpush3.bf16.xpose.msra.mxu0 %v233_v13 }
  0x43   :  { %235 = vmatprep.subr.bf16.mxu0 %v331_v0 }
  0x4a   :  { %237 = vmatpush3.bf16.xpose.msra.mxu0 %v236_v16 }
  0x4b   :  { %238 = vmatprep.subr.bf16.mxu0 %v331_v0 }
  0x52   :  { %240 = vmatpush3.bf16.xpose.msra.mxu0 %v239_v19 }
  0x53   :  { %241 = vmatprep.subr.bf16.mxu0 %v331_v0 }
  0x5a   :  { %243 = vmatpush3.bf16.xpose.msra.mxu0 %v242_v22 }
  0x5b   :  { %244 = vmatprep.subr.bf16.mxu0 %v331_v0 }
  0x62   :  { %246 = vmatpush3.bf16.xpose.msra.mxu0 %v245_v25 }
  0x69   :  { %221 = vmatmul.mubr.f32.vlgmr.msra.gmra.mrb[0].mxu0 %v50_v26 }
 0x13c   :  { %v134_v28 = vpop.f32.mrb[0].mxu0 }
 0x13d   :  { %v151_v29 = vadd.f32 %v170_v27, %v134_v28  ;;  %v222_v30 = vpop.f32.mrb[1].mxu0 }
 0x13f   :  { %152 = vst [vmem:[#allocation8] sm:$0xff] %v151_v29 }
 0x140   :  { %310 = shalt.err (!%p307_p6)
}
 0x141   :  { %s311_s16 = scalar_lea.hbm %s404_s3, 128 }
 0x142   :  { %p312_p7 = scmp.ne.s32.totalorder %s404_s3, %s311_s16  ;;  %p315_p8 = scmp.lt.u32.totalorder %s311_s16, %s404_s3 }
 0x144   :  { %p317_p9 = pnand %p315_p8, %p312_p7 }
 0x146   :  { %320 = shalt.err (!%p317_p9)
}
 0x147   :  { %162 = dma.vmem_to_hbm [thread:$0]  %s160_s12, 128, %s404_s3, [#allocation5]  }
 0x148   :  { %325 = dma.done.wait [#allocation5], 128  }
 0x149   :  { %326 = vsyncadd [#allocation5], 4294967168 }
 0x14a   :  { %166 = vsyncpa [#allocation4], 1 }
 0x14b   :  { %167 = vsyncpa [#allocation7], 1 }
 0x14c   :  { %168 = vsyncpa [#allocation5], 1 }

</bundles_post_ra>
